<compile_context>
chip_gen: v7x
topology: tpu7x:2x2x1
jax: 0.10.0
libtpu: 0.0.40
codegen_flags: <defaults>
</compile_context>

<pallas_src>
import functools

import jax
import jax.numpy as jnp
from jax.experimental import pallas as pl
from jax.experimental.pallas import tpu as pltpu


_INV_SQRT2 = 0.7071067811865476

# Weight (in compute dtype) is kept fully VMEM-resident below this size.
_WEIGHT_RESIDENT_MAX_BYTES = 12 * 1024 * 1024
# Target double-buffered working set (leaves headroom inside the 48 MiB limit).
_VMEM_TARGET_BYTES = 40 * 1024 * 1024
# Scoped VMEM limit: above v5e/v6e defaults, safely under v7x's 64 MiB per TC.
_VMEM_LIMIT_BYTES = 48 * 1024 * 1024


def _gelu_exact(x_f32):
    # PyTorch F.gelu default = exact erf formulation (computed in f32).
    return 0.5 * x_f32 * (1.0 + jax.lax.erf(x_f32 * _INV_SQRT2))


def bert_intermediate_kernel(x_ref, w_ref, b_ref, o_ref):
    # x_ref: (tm, H) compute dtype   w_ref: (H, block_n) compute dtype
    # b_ref: (1, block_n) f32        o_ref: (tm, block_n) output dtype
    # Output-stationary: the whole K (hidden) dim is consumed in one MXU dot;
    # bias + exact GELU epilogue fused in f32 before the down-cast store.
    acc = jnp.dot(x_ref[...], w_ref[...], preferred_element_type=jnp.float32)
    acc = acc + b_ref[...]
    o_ref[...] = _gelu_exact(acc).astype(o_ref.dtype)


def _round_up(x, m):
    return (x + m - 1) // m * m


def _pick_tn(n):
    # Prefer lane-dense multiples of 256 (v6e/v7x MXU is 2x256x256); 128 only
    # as a last resort, else the full width.
    for tn in (1024, 512, 256, 128):
        if n % tn == 0:
            return tn
    return n


@functools.partial(jax.jit, static_argnames=("tm", "compute_dtype", "out_dtype"))
def bert_intermediate(hidden_states, weight, bias, *, tm=512,
                      compute_dtype=jnp.bfloat16, out_dtype=None):
    """hidden_states: [B, S, H]; weight: [H, I] (W^T of torch's [I, H] Linear
    weight); bias: [I].  Returns [B, S, I] in `out_dtype` (default: the input
    dtype, preserving the module semantics; pass jnp.bfloat16 to halve the
    writeback stream when the consumer re-casts anyway)."""
    B, S, H = hidden_states.shape
    I = weight.shape[1]
    M = B * S
    out_dtype = jnp.dtype(out_dtype) if out_dtype is not None else hidden_states.dtype
    c_item = jnp.dtype(compute_dtype).itemsize
    o_item = jnp.dtype(out_dtype).itemsize

    # ---- hoisted casts: no-ops when the caller pre-casts & caches weights ---
    x2d = hidden_states.reshape(M, H)
    if x2d.dtype != compute_dtype:
        x2d = x2d.astype(compute_dtype)
    w_c = weight if weight.dtype == compute_dtype else weight.astype(compute_dtype)
    b2d = bias.reshape(1, I)
    if b2d.dtype != jnp.float32:
        b2d = b2d.astype(jnp.float32)

    # ---- weight residency decision & N tile ---------------------------------
    weight_resident = (H * I * c_item) <= _WEIGHT_RESIDENT_MAX_BYTES
    block_n = I if weight_resident else _pick_tn(I)

    # ---- token (M) tile: big by default, sublane aligned, VMEM-budgeted -----
    m_align = 16 if c_item == 2 else 8
    tm_eff = _round_up(min(tm, max(M, 1)), m_align)

    def _budget(tm_):
        return (2 * tm_ * H * c_item            # x tile, double buffered
                + 2 * H * block_n * c_item      # weight (conservatively x2)
                + 2 * block_n * 4               # bias (f32)
                + 2 * tm_ * block_n * o_item)   # out tile, double buffered

    while _budget(tm_eff) > _VMEM_TARGET_BYTES and tm_eff > m_align:
        tm_eff = max(m_align, _round_up(tm_eff // 2, m_align))

    # Ragged M: pad only the (rare) non-multiple tail; aligned M is zero-copy.
    Mp = _round_up(M, tm_eff)
    if Mp != M:
        x2d = jnp.pad(x2d, ((0, Mp - M), (0, 0)))
    num_m = Mp // tm_eff

    if weight_resident:
        # 1-D grid over token tiles; weight & bias blocks are grid-invariant
        # (constant index_map) -> DMA'd from HBM exactly once.
        grid = (num_m,)
        in_specs = [
            pl.BlockSpec((tm_eff, H), lambda i: (i, 0)),   # token tile
            pl.BlockSpec((H, I), lambda i: (0, 0)),        # resident weight
            pl.BlockSpec((1, I), lambda i: (0, 0)),        # resident bias
        ]
        out_specs = pl.BlockSpec((tm_eff, I), lambda i: (i, 0))
        dim_sem = ("parallel",)
        x_streams, w_streams = 1, 1
    else:
        # Huge weight: tile N, but keep the N axis OUTER and tokens INNER so
        # each weight tile's block index is constant across the inner loop
        # (weight still streamed from HBM exactly once in total).
        grid = (I // block_n, num_m)
        in_specs = [
            pl.BlockSpec((tm_eff, H), lambda j, i: (i, 0)),
            pl.BlockSpec((H, block_n), lambda j, i: (0, j)),
            pl.BlockSpec((1, block_n), lambda j, i: (0, j)),
        ]
        out_specs = pl.BlockSpec((tm_eff, block_n), lambda j, i: (i, j))
        dim_sem = ("parallel", "parallel")
        x_streams, w_streams = I // block_n, 1

    cost = pl.CostEstimate(
        flops=2 * Mp * H * I,
        transcendentals=0,  # erf lowers to a VPU polynomial, not an EUP op
        bytes_accessed=(x_streams * Mp * H * c_item
                        + w_streams * H * I * c_item
                        + I * 4
                        + Mp * I * o_item),
    )

    out2d = pl.pallas_call(
        bert_intermediate_kernel,
        out_shape=jax.ShapeDtypeStruct((Mp, I), out_dtype),
        grid_spec=pltpu.PrefetchScalarGridSpec(
            num_scalar_prefetch=0,
            grid=grid,
            in_specs=in_specs,
            out_specs=out_specs,
        ),
        compiler_params=pltpu.CompilerParams(
            dimension_semantics=dim_sem,
            vmem_limit_bytes=_VMEM_LIMIT_BYTES,
        ),
        cost_estimate=cost,
    )(x2d, w_c, b2d)

    if Mp != M:
        out2d = out2d[:M]
    return out2d.reshape(B, S, I)


def _reference(x, w, b, compute_dtype):
    M = x.shape[0] * x.shape[1]
    acc = jnp.dot(x.reshape(M, -1).astype(compute_dtype), w.astype(compute_dtype),
                  preferred_element_type=jnp.float32) + b.astype(jnp.float32)
    ref = _gelu_exact(acc).astype(x.dtype)
    return ref.reshape(x.shape[0], x.shape[1], w.shape[1])


if __name__ == "__main__":
    key = jax.random.PRNGKey(0)
    k_x, k_w, k_b, k_x2, k_w3, k_b3, k_x3 = jax.random.split(key, 7)

    # Small config consistent with BertIntermediate: Linear(hidden, intermediate) + gelu.
    hidden, intermediate = 32, 64
    # torch Linear stores weight as [out, in]; we materialize W^T as [hidden, intermediate].
    w = jax.random.normal(k_w, (hidden, intermediate), dtype=jnp.float32) * 0.02
    b = jax.random.normal(k_b, (intermediate,), dtype=jnp.float32) * 0.02

    # Case 1: aligned M (batch=2, seq=8 -> M=16), VMEM-resident weight path.
    x = jax.random.normal(k_x, (2, 8, hidden), dtype=jnp.float32)
    out = jax.block_until_ready(bert_intermediate(x, w, b))
    assert out.shape == (2, 8, intermediate)
    assert jnp.allclose(out, _reference(x, w, b, jnp.bfloat16), atol=1e-3, rtol=1e-3)
    assert jnp.allclose(out, _reference(x, w, b, jnp.float32), atol=2e-2, rtol=2e-2)

    # Case 2: ragged M (batch=3, seq=5 -> M=15) exercises the padded-tail path.
    x2 = jax.random.normal(k_x2, (3, 5, hidden), dtype=jnp.float32)
    out2 = jax.block_until_ready(bert_intermediate(x2, w, b))
    assert out2.shape == (3, 5, intermediate)
    assert jnp.allclose(out2, _reference(x2, w, b, jnp.bfloat16), atol=1e-3, rtol=1e-3)

    # Case 3: lane-aligned shapes (hidden=128, intermediate=512, M=128) with
    # caller-chosen bf16 output and a pre-cast (cached) bf16 weight.
    h3, i3 = 128, 512
    w3 = (jax.random.normal(k_w3, (h3, i3), dtype=jnp.float32) * 0.02).astype(jnp.bfloat16)
    b3 = jax.random.normal(k_b3, (i3,), dtype=jnp.float32) * 0.02
    x3 = jax.random.normal(k_x3, (2, 64, h3), dtype=jnp.float32)
    out3 = jax.block_until_ready(
        bert_intermediate(x3, w3, b3, out_dtype=jnp.bfloat16))
    assert out3.shape == (2, 64, i3)
    ref3 = _reference(x3, w3, b3, jnp.bfloat16).astype(jnp.bfloat16)
    assert jnp.allclose(out3.astype(jnp.float32), ref3.astype(jnp.float32),
                        atol=2e-2, rtol=2e-2)

    print("KERNEL_OK")
</pallas_src>

<mosaic_0001>
module attributes {stable_mosaic.version = 11 : i64} {
  func.func @bert_intermediate_kernel(%arg0: i32, %arg1: memref<16x32xbf16, #tpu.memory_space<vmem>>, %arg2: memref<32x64xbf16, #tpu.memory_space<vmem>>, %arg3: memref<1x64xf32, #tpu.memory_space<vmem>>, %arg4: memref<16x64xf32, #tpu.memory_space<vmem>>) attributes {dimension_semantics = [#tpu.dimension_semantics<parallel>], iteration_bounds = array<i64: 1>, scalar_prefetch = 0 : i64, scratch_operands = 0 : i64, tpu.core_type = #tpu.core_type<tc>, window_params = [{transform_indices = @transform_0, window_bounds = array<i64: 16, 32>}, {pipeline_mode = #tpu.pipeline_mode<synchronous>, transform_indices = @transform_1, window_bounds = array<i64: 32, 64>}, {pipeline_mode = #tpu.pipeline_mode<synchronous>, transform_indices = @transform_2, window_bounds = array<i64: 1, 64>}, {transform_indices = @transform_3, window_bounds = array<i64: 16, 64>}]} {
    %c0 = arith.constant 0 : index
    %c0_0 = arith.constant 0 : index
    %0 = vector.load %arg1[%c0, %c0_0] : memref<16x32xbf16, #tpu.memory_space<vmem>>, vector<16x32xbf16>
    %c0_1 = arith.constant 0 : index
    %c0_2 = arith.constant 0 : index
    %1 = vector.load %arg2[%c0_1, %c0_2] : memref<32x64xbf16, #tpu.memory_space<vmem>>, vector<32x64xbf16>
    %cst = arith.constant dense<0.000000e+00> : vector<16x64xf32>
    %2 = tpu.matmul %0, %1, %cst {dimension_numbers = #tpu.dot_dimension_numbers<[1], [0], [0], [1], [0, 0, 1, 1], [], []>} : vector<16x32xbf16>, vector<32x64xbf16>, vector<16x64xf32> -> vector<16x64xf32>
    %c0_3 = arith.constant 0 : index
    %c0_4 = arith.constant 0 : index
    %3 = vector.load %arg3[%c0_3, %c0_4] : memref<1x64xf32, #tpu.memory_space<vmem>>, vector<1x64xf32>
    %4 = vector.broadcast %3 : vector<1x64xf32> to vector<16x64xf32>
    %5 = arith.addf %2, %4 : vector<16x64xf32>
    %cst_5 = arith.constant 5.000000e-01 : f32
    %6 = vector.broadcast %cst_5 : f32 to vector<16x64xf32>
    %7 = arith.mulf %6, %5 : vector<16x64xf32>
    %cst_6 = arith.constant 0.707106769 : f32
    %8 = vector.broadcast %cst_6 : f32 to vector<16x64xf32>
    %9 = arith.mulf %5, %8 : vector<16x64xf32>
    %10 = math.erf %9 : vector<16x64xf32>
    %cst_7 = arith.constant 1.000000e+00 : f32
    %11 = vector.broadcast %cst_7 : f32 to vector<16x64xf32>
    %12 = arith.addf %11, %10 : vector<16x64xf32>
    %13 = arith.mulf %7, %12 : vector<16x64xf32>
    %c0_8 = arith.constant 0 : index
    %c0_9 = arith.constant 0 : index
    %14 = vector.load %arg4[%c0_8, %c0_9] : memref<16x64xf32, #tpu.memory_space<vmem>>, vector<16x64xf32>
    tpu.vector_store %arg4[%c0_8, %c0_9], %13 {strides = array<i32>} : memref<16x64xf32, #tpu.memory_space<vmem>>, vector<16x64xf32>,
    return
  }
  func.func @transform_0(%arg0: i32) -> (i32, i32) {
    %c0_i32 = arith.constant 0 : i32
    %c0_i32_0 = arith.constant 0 : i32
    return %arg0, %c0_i32 : i32, i32
  }
  func.func @transform_1(%arg0: i32) -> (i32, i32) {
    %c0_i32 = arith.constant 0 : i32
    %c0_i32_0 = arith.constant 0 : i32
    %c0_i32_1 = arith.constant 0 : i32
    return %c0_i32, %c0_i32_0 : i32, i32
  }
  func.func @transform_2(%arg0: i32) -> (i32, i32) {
    %c0_i32 = arith.constant 0 : i32
    %c0_i32_0 = arith.constant 0 : i32
    %c0_i32_1 = arith.constant 0 : i32
    return %c0_i32, %c0_i32_0 : i32, i32
  }
  func.func @transform_3(%arg0: i32) -> (i32, i32) {
    %c0_i32 = arith.constant 0 : i32
    %c0_i32_0 = arith.constant 0 : i32
    return %arg0, %c0_i32 : i32, i32
  }
}

</mosaic_0001>

<bundles_post_ra>
// kernel: bert_intermediate.1
= control target key start
LH: loop header
LB: loop body
LE: loop exit
PB: predicated region body
PF: predicated region fallthrough
CT: control target
= control target key end

     0   :  { %v172_v1 = vmov 0.0   ;;  %vm173_vm0 = vmmov 0   ;;  %s221_s0 = inlined_call_operand.vmem [shape: bf16[16,32], index: 0, kind: input, shape index: {}]   ;;  %s222_s1 = inlined_call_operand.vmem [shape: bf16[32,64], index: 1, kind: input, shape index: {}]   ;;  %s223_s2 = inlined_call_operand.vmem [shape: f32[1,64], index: 2, kind: input, shape index: {}]   ;;  %s224_s3 = inlined_call_operand.hbm [shape: f32[16,64], index: 3, kind: output, shape index: {}]  }
   0x1   :  { %v141_v0 = vld [vmem:[%s222_s1] sm:$0xff]   ;;  %128 = vmatprep.subr.bf16.mxu0 %v172_v1  ;;  %v142_v2 = vld [vmem:[%s222_s1 + $0x8] sm:$0xff]   ;;  %132 = vmatprep.mubr.msk.bf16.mxu0 %vm173_vm0, %v172_v1 }
   0x2   :  { %129 = vmatpush3.bf16.msra.mxu0 %v141_v0 }
   0x3   :  { %130 = vmatprep.subr.bf16.mxu0 %v172_v1 }
   0x4   :  { %8 = vsyncpa [#allocation3], 0  ;;  %v143_v3 = vld [vmem:[%s221_s0] sm:$0xff]   ;;  %vm46_vm1 = vcmask 261120   ;;  %s174_s0 = smov [#allocation2]   ;;  %vm101_vm2 = vcmask 523264  }
   0x5   :  { %v120_v4 = vld [vmem:[%s223_s2] ss:$0 sm:$0xff]  ;;  %s109_s1 = sshll.u32 %s174_s0, 4  ;;  %s110_s1 = int_to_ptr.vmem [resolvable:$true] %s109_s1 }
   0x6   :  { %131 = vmatpush3.bf16.msra.mxu0 %v142_v2  ;;  %s148_s2 = scalar_lea.vmem %s110_s1, 256  ;;  %p153_p1 = scmp.lt.s32.totalorder %s110_s1, %s110_s1 }
   0x7   :  { %p149_p0 = scmp.ne.s32.totalorder %s110_s1, %s148_s2  ;;  %p154_p2 = scmp.lt.s32.totalorder %s148_s2, %s148_s2 }
   0x9   :  { %133 = vmatmul.mubr.msk.bf16.vlgmr.msra.gmra.mrb[0].mxu0 %vm46_vm1, %v143_v3  ;;  %p155_p3 = por %p154_p2, %p153_p1 }
   0xb   :  { %p156_p4 = pnand %p155_p3, %p149_p0 }
  0xdc   :  { %v84_v5 = vpop.f32.mrb[0].mxu0 }
  0xdd   :  { %v85_v6 = vadd.f32 %v120_v4, %v84_v5  ;;  %v134_v7 = vpop.f32.mrb[1].mxu0 }
  0xde   :  { %v87_v8 = vpop.f32.mrb[2].mxu0 }
  0xdf   :  { %v93_v9 = vmul.f32 0.70710677, %v85_v6  ;;  %v88_v10 = vadd.f32 %v120_v4, %v87_v8  ;;  %v135_v11 = vpop.f32.mrb[3].mxu0  ;;  %v91_v14 = vmul.f32 0.5, %v85_v6 }
  0xe1   :  { %144 = verf.f32 %v93_v9  ;;  %v94_v12 = vmul.f32 0.70710677, %v88_v10  ;;  %v92_v18 = vmul.f32 0.5, %v88_v10 }
  0xe3   :  { %146 = verf.f32 %v94_v12 }
  0xeb   :  { %v145_v13 = vpop.eup %144 }
  0xec   :  { %v97_v15 = vadd.f32 1.0, %v145_v13 }
  0xed   :  { %v147_v16 = vpop.eup %146 }
  0xee   :  { %v99_v17 = vmul.f32 %v97_v15, %v91_v14  ;;  %v98_v19 = vadd.f32 1.0, %v147_v16 }
  0xf0   :  { %102 = vst.msk [vmem:[#allocation2] sm:$0xff] %vm101_vm2, %v99_v17  ;;  %v100_v20 = vmul.f32 %v98_v19, %v92_v18 }
  0xf2   :  { %103 = vst.msk [vmem:[#allocation2 + $0x8] sm:$0xff] %vm101_vm2, %v100_v20 }
  0xf3   :  { %159 = shalt.err (!%p156_p4)
}
  0xf4   :  { %s160_s22 = scalar_lea.hbm %s224_s3, 256 }
  0xf5   :  { %p161_p5 = scmp.ne.s32.totalorder %s224_s3, %s160_s22  ;;  %p164_p6 = scmp.lt.u32.totalorder %s160_s22, %s224_s3 }
  0xf7   :  { %p166_p7 = pnand %p164_p6, %p161_p5 }
  0xf9   :  { %169 = shalt.err (!%p166_p7)
}
  0xfa   :  { %s175_s27 = smov 128   ;;  %s176_s28 = smov 8  }
  0xfb   :  { %115 = dma.vmem_to_hbm [thread:$0]  %s110_s1, 256, %s224_s3, [#allocation3], %s175_s27, %s175_s27, %s176_s28  }
  0xfc   :  { %170 = dma.done.wait [#allocation3], 256  }
  0xfd   :  { %171 = vsyncadd [#allocation3], 4294967040 }
  0xfe   :  { %119 = vsyncpa [#allocation3], 1 }

</bundles_post_ra>
